<compile_context>
chip_gen: v7x
topology: tpu7x:2x2x1
jax: 0.10.0
libtpu: 0.0.40
codegen_flags: <defaults>
</compile_context>

<pallas_src>
import jax
import jax.numpy as jnp
from jax.experimental import pallas as pl
from jax.experimental.pallas import tpu as pltpu


# --------------------------------------------------------------------------- #
# helpers
# --------------------------------------------------------------------------- #
def _round_up(x: int, m: int) -> int:
    return ((x + m - 1) // m) * m


def _nbytes(a) -> int:
    return int(a.size) * jnp.dtype(a.dtype).itemsize


def _vmem_cap_bytes() -> int:
    """Per-generation VMEM cap with headroom for compiler-internal scratch."""
    try:
        info = pltpu.get_tpu_info()
        cap = int(getattr(info, "vmem_capacity_bytes", 0) or 0)
        if cap > 0:
            return (cap * 3) // 4          # 75% of physical (v7x: 48 of 64 MiB)
    except Exception:
        pass
    return 48 * 1024 * 1024                # safe on v5e / v6e / v7x


def _num_tensorcores_per_chip() -> int:
    try:
        kind = jax.devices()[0].device_kind.lower()
        if "v7" in kind:                   # v7x has 2 TensorCores per chip
            return 2
    except Exception:
        pass
    return 1


# --------------------------------------------------------------------------- #
# kernels
# --------------------------------------------------------------------------- #
def _fc_zeros_kernel_fastk(x_ref, w_ref, bs_ref, o_ref):
    """K untiled: fused matmul + epilogue, no accumulator round-trip."""
    acc = jnp.dot(x_ref[...], w_ref[...], preferred_element_type=jnp.float32)
    # bs row 0 = exp(logs*f), row 1 = b * exp(logs*f)  ->  (acc + b) * scale
    o_ref[...] = (acc * bs_ref[0:1, :] + bs_ref[1:2, :]).astype(o_ref.dtype)


def _fc_zeros_kernel_ktiled(x_ref, w_ref, bs_ref, o_ref, acc_ref):
    """K tiled (innermost grid axis): first-iteration write, then accumulate."""
    k = pl.program_id(2)
    part = jnp.dot(x_ref[...], w_ref[...], preferred_element_type=jnp.float32)

    @pl.when(k == 0)
    def _():
        acc_ref[...] = part

    @pl.when(k > 0)
    def _():
        acc_ref[...] += part

    @pl.when(k == pl.num_programs(2) - 1)
    def _():
        o_ref[...] = (acc_ref[...] * bs_ref[0:1, :] + bs_ref[1:2, :]).astype(o_ref.dtype)


# --------------------------------------------------------------------------- #
# parameter preprocessing (hoisted out of the per-call path)
# --------------------------------------------------------------------------- #
_K_UNTILED_MAX = 2048   # full-extent K block up to this depth


def fc_zeros_prepare(w, b, logs, logscale_factor=3):
    """Pad / fuse the static parameters once (call at parameter-setup time)."""
    n_in, width = w.shape

    # Grid-invariant epilogue terms, pre-folded: scale and b*scale (f32).
    scale = jnp.exp(logs.astype(jnp.float32) * logscale_factor)     # (1, width)
    bias_scaled = b.astype(jnp.float32) * scale                     # (1, width)

    # ---- N tiling: lane-dense, 256-multiples preferred (v6e/v7x 256x256 MXU) ----
    if width <= 128:
        width_p, tile_n = 128, 128
    else:
        width_p, tile_n = _round_up(width, 256), 256
        wp512 = _round_up(width, 512)
        if wp512 <= width_p + width_p // 8:      # allow ~12.5% extra pad for 512 tiles
            width_p, tile_n = wp512, 512

    # ---- K tiling: untiled up to 2048, else largest tile with modest padding ----
    if n_in <= _K_UNTILED_MAX:
        k_dim, tile_k = n_in, n_in
    else:
        k_dim, tile_k = _round_up(n_in, 256), 256
        for c in (2048, 1024, 512):
            kd = _round_up(n_in, c)
            if kd <= k_dim + k_dim // 8:
                k_dim, tile_k = kd, c
                break

    pad_n, pad_k = width_p - width, k_dim - n_in
    if pad_n or pad_k:
        w = jnp.pad(w, ((0, pad_k), (0, pad_n)))
    bs = jnp.concatenate([scale, bias_scaled], axis=0)               # (2, width)
    if pad_n:
        bs = jnp.pad(bs, ((0, 0), (0, pad_n)))                       # (2, width_p)

    return dict(w=w, bs=bs, n_in=n_in, width=width,
                k_dim=k_dim, width_p=width_p, tile_k=tile_k, tile_n=tile_n)


# --------------------------------------------------------------------------- #
# forward
# --------------------------------------------------------------------------- #
def fc_zeros_apply(x, prepared, *, block_b=None):
    B, n_in = x.shape
    assert n_in == prepared["n_in"], (n_in, prepared["n_in"])
    out_dtype = x.dtype
    w, bs = prepared["w"], prepared["bs"]
    width, width_p = prepared["width"], prepared["width_p"]
    k_dim, tile_k, tile_n = prepared["k_dim"], prepared["tile_k"], prepared["tile_n"]

    if k_dim != n_in:                                   # only x is padded per call
        x = jnp.pad(x, ((0, 0), (0, k_dim - n_in)))

    # ---- batch tile: the whole batch up to 512 rows; split only above that ----
    if block_b is None:
        block_b = B if B <= 512 else 512

    nb = pl.cdiv(B, block_b)
    nn = width_p // tile_n
    nk = k_dim // tile_k

    # ---- v7x only: guarantee >=2 parallel grid steps so both TCs get work ----
    sub = 16 if x.dtype == jnp.bfloat16 else 8
    if _num_tensorcores_per_chip() >= 2 and nb * nn == 1:
        if tile_n >= 256:
            tile_n //= 2
            nn = width_p // tile_n
        elif B >= 2 * sub:
            block_b = _round_up(pl.cdiv(B, 2), sub)
            nb = pl.cdiv(B, block_b)

    x_itemsize = jnp.dtype(x.dtype).itemsize
    w_itemsize = jnp.dtype(w.dtype).itemsize
    out_itemsize = jnp.dtype(out_dtype).itemsize

    vmem_est = (
        2 * block_b * tile_k * x_itemsize        # x tiles (double-buffered)
        + 2 * tile_k * tile_n * w_itemsize       # w tiles
        + 2 * 8 * tile_n * 4                     # fused bias/scale tiles (8-sublane pad)
        + 2 * block_b * tile_n * out_itemsize    # out tiles
        + (block_b * tile_n * 4 if nk > 1 else 0)  # accumulator scratch
    )
    vmem_limit = int(min(_vmem_cap_bytes(), max(2 * vmem_est, 32 * 1024 * 1024)))

    cost = pl.CostEstimate(
        flops=2 * B * k_dim * width_p + 2 * B * width_p,
        transcendentals=0,                       # exp hoisted into prepare()
        bytes_accessed=_nbytes(x) + _nbytes(w) + _nbytes(bs) + B * width_p * out_itemsize,
    )

    if nk == 1:
        # ---------------- fast path: K untiled, no accumulator ----------------
        # Grid order chosen so the larger re-fetch stream becomes inner-invariant:
        #   (B outer, N inner): x DMA'd once, w re-fetched nb times
        #   (N outer, B inner): w DMA'd once, x re-fetched nn times
        x_bytes = B * k_dim * x_itemsize
        w_bytes = k_dim * width_p * w_itemsize
        if nn * x_bytes + w_bytes < x_bytes + nb * w_bytes:
            grid = (nn, nb)
            x_spec = pl.BlockSpec((block_b, k_dim), lambda j, i: (i, 0))
            w_spec = pl.BlockSpec((k_dim, tile_n), lambda j, i: (0, j))
            bs_spec = pl.BlockSpec((2, tile_n), lambda j, i: (0, j))
            o_spec = pl.BlockSpec((block_b, tile_n), lambda j, i: (i, j))
        else:
            grid = (nb, nn)
            x_spec = pl.BlockSpec((block_b, k_dim), lambda i, j: (i, 0))
            w_spec = pl.BlockSpec((k_dim, tile_n), lambda i, j: (0, j))
            bs_spec = pl.BlockSpec((2, tile_n), lambda i, j: (0, j))
            o_spec = pl.BlockSpec((block_b, tile_n), lambda i, j: (i, j))

        out_padded = pl.pallas_call(
            _fc_zeros_kernel_fastk,
            out_shape=jax.ShapeDtypeStruct((B, width_p), out_dtype),
            grid_spec=pltpu.PrefetchScalarGridSpec(
                num_scalar_prefetch=0,
                grid=grid,
                in_specs=[x_spec, w_spec, bs_spec],
                out_specs=o_spec,
            ),
            compiler_params=pltpu.CompilerParams(
                dimension_semantics=("parallel", "parallel"),
                vmem_limit_bytes=vmem_limit,
            ),
            cost_estimate=cost,
        )(x, w, bs)
    else:
        # ---------------- deep-K path: K innermost, f32 accumulator ----------------
        out_padded = pl.pallas_call(
            _fc_zeros_kernel_ktiled,
            out_shape=jax.ShapeDtypeStruct((B, width_p), out_dtype),
            grid_spec=pltpu.PrefetchScalarGridSpec(
                num_scalar_prefetch=0,
                grid=(nb, nn, nk),
                in_specs=[
                    pl.BlockSpec((block_b, tile_k), lambda i, j, k: (i, k)),   # x
                    pl.BlockSpec((tile_k, tile_n), lambda i, j, k: (k, j)),    # w
                    pl.BlockSpec((2, tile_n), lambda i, j, k: (0, j)),         # scale / b*scale
                ],
                out_specs=pl.BlockSpec((block_b, tile_n), lambda i, j, k: (i, j)),
                scratch_shapes=[pltpu.VMEM((block_b, tile_n), jnp.float32)],
            ),
            compiler_params=pltpu.CompilerParams(
                dimension_semantics=("parallel", "parallel", "arbitrary"),
                vmem_limit_bytes=vmem_limit,
            ),
            cost_estimate=cost,
        )(x, w, bs)

    if width_p != width:
        out_padded = out_padded[:, :width]
    return out_padded


def fc_zeros_forward(x, w, b, logs, logscale_factor=3, skip=1, *, block_b=None):
    """Convenience one-shot wrapper (skip is unused, as in the PyTorch module)."""
    del skip
    prepared = fc_zeros_prepare(w, b, logs, logscale_factor)
    return fc_zeros_apply(x, prepared, block_b=block_b)


# --------------------------------------------------------------------------- #
# reference + checks
# --------------------------------------------------------------------------- #
def _reference(x, w, b, logs, logscale_factor):
    y = jnp.dot(x, w, preferred_element_type=jnp.float32,
                precision=jax.lax.Precision.HIGHEST)
    return ((y + b) * jnp.exp(logs * logscale_factor)).astype(x.dtype)


def _check(B, n_in, width, logscale_factor, seed, atol=2e-3, rtol=2e-3):
    key = jax.random.PRNGKey(seed)
    kx, kw, kb, kl = jax.random.split(key, 4)
    x = jax.random.normal(kx, (B, n_in), dtype=jnp.float32)
    # Module __init__ uses zeros for all params; use small deterministic random
    # values so the kernel computes something non-trivial (shapes match
    # nn.Parameter(torch.zeros(...)) exactly).
    w = 0.1 * jax.random.normal(kw, (n_in, width), dtype=jnp.float32)
    b = 0.1 * jax.random.normal(kb, (1, width), dtype=jnp.float32)
    logs = 0.1 * jax.random.normal(kl, (1, width), dtype=jnp.float32)

    prepared = fc_zeros_prepare(w, b, logs, logscale_factor)   # hoisted param pad/fuse
    out = jax.block_until_ready(fc_zeros_apply(x, prepared))
    ref = _reference(x, w, b, logs, logscale_factor)
    assert out.shape == (B, width), (out.shape, (B, width))
    assert jnp.allclose(out, ref, atol=atol, rtol=rtol), (
        f"mismatch vs reference for shape {(B, n_in, width)}"
    )


if __name__ == "__main__":
    # Module-sized small problem (PRNGKey(0)): B=8, n_in=32, width=32.
    _check(B=8, n_in=32, width=32, logscale_factor=3, seed=0)

    # Fast path: untiled K, width padded to 256, whole batch as one tile.
    _check(B=48, n_in=1280, width=200, logscale_factor=3, seed=1)

    # Deep-K path: K tiled to 512 (padded 2304->2560), width padded to 512,
    # batch split (B > 512), first-iteration-write accumulator.
    _check(B=640, n_in=2304, width=384, logscale_factor=3, seed=2,
           atol=5e-3, rtol=5e-3)

    print("KERNEL_OK")
</pallas_src>

<mosaic_0001>
module attributes {stable_mosaic.version = 11 : i64} {
  func.func @_fc_zeros_kernel_fastk(%arg0: i32, %arg1: i32, %arg2: memref<8x32xf32, #tpu.memory_space<vmem>>, %arg3: memref<32x128xf32, #tpu.memory_space<vmem>>, %arg4: memref<2x128xf32, #tpu.memory_space<vmem>>, %arg5: memref<8x128xf32, #tpu.memory_space<vmem>>) attributes {dimension_semantics = [#tpu.dimension_semantics<parallel>, #tpu.dimension_semantics<parallel>], iteration_bounds = array<i64: 1, 1>, scalar_prefetch = 0 : i64, scratch_operands = 0 : i64, tpu.core_type = #tpu.core_type<tc>, window_params = [{transform_indices = @transform_0, window_bounds = array<i64: 8, 32>}, {transform_indices = @transform_1, window_bounds = array<i64: 32, 128>}, {transform_indices = @transform_2, window_bounds = array<i64: 2, 128>}, {transform_indices = @transform_3, window_bounds = array<i64: 8, 128>}]} {
    %c0 = arith.constant 0 : index
    %c0_0 = arith.constant 0 : index
    %0 = vector.load %arg2[%c0, %c0_0] : memref<8x32xf32, #tpu.memory_space<vmem>>, vector<8x32xf32>
    %c0_1 = arith.constant 0 : index
    %c0_2 = arith.constant 0 : index
    %1 = vector.load %arg3[%c0_1, %c0_2] : memref<32x128xf32, #tpu.memory_space<vmem>>, vector<32x128xf32>
    %cst = arith.constant dense<0.000000e+00> : vector<8x128xf32>
    %2 = tpu.matmul %0, %1, %cst {dimension_numbers = #tpu.dot_dimension_numbers<[1], [0], [0], [1], [0, 0, 1, 1], [], []>} : vector<8x32xf32>, vector<32x128xf32>, vector<8x128xf32> -> vector<8x128xf32>
    %c0_3 = arith.constant 0 : index
    %c0_4 = arith.constant 0 : index
    %3 = vector.load %arg4[%c0_3, %c0_4] : memref<2x128xf32, #tpu.memory_space<vmem>>, vector<1x128xf32>
    %4 = vector.broadcast %3 : vector<1x128xf32> to vector<8x128xf32>
    %5 = arith.mulf %2, %4 : vector<8x128xf32>
    %c1 = arith.constant 1 : index
    %c0_5 = arith.constant 0 : index
    %6 = vector.load %arg4[%c1, %c0_5] : memref<2x128xf32, #tpu.memory_space<vmem>>, vector<1x128xf32>
    %7 = vector.broadcast %6 : vector<1x128xf32> to vector<8x128xf32>
    %8 = arith.addf %5, %7 : vector<8x128xf32>
    %c0_6 = arith.constant 0 : index
    %c0_7 = arith.constant 0 : index
    %9 = vector.load %arg5[%c0_6, %c0_7] : memref<8x128xf32, #tpu.memory_space<vmem>>, vector<8x128xf32>
    tpu.vector_store %arg5[%c0_6, %c0_7], %8 {strides = array<i32>} : memref<8x128xf32, #tpu.memory_space<vmem>>, vector<8x128xf32>,
    return
  }
  func.func @transform_0(%arg0: i32, %arg1: i32) -> (i32, i32) {
    %c0_i32 = arith.constant 0 : i32
    %c0_i32_0 = arith.constant 0 : i32
    return %arg0, %c0_i32 : i32, i32
  }
  func.func @transform_1(%arg0: i32, %arg1: i32) -> (i32, i32) {
    %c0_i32 = arith.constant 0 : i32
    %c0_i32_0 = arith.constant 0 : i32
    return %c0_i32, %arg1 : i32, i32
  }
  func.func @transform_2(%arg0: i32, %arg1: i32) -> (i32, i32) {
    %c0_i32 = arith.constant 0 : i32
    %c0_i32_0 = arith.constant 0 : i32
    return %c0_i32, %arg1 : i32, i32
  }
  func.func @transform_3(%arg0: i32, %arg1: i32) -> (i32, i32) {
    %c0_i32 = arith.constant 0 : i32
    return %arg0, %arg1 : i32, i32
  }
}

</mosaic_0001>

<bundles_post_ra>
// kernel: tpu_custom_call.1
= control target key start
LH: loop header
LB: loop body
LE: loop exit
PB: predicated region body
PF: predicated region fallthrough
CT: control target
= control target key end

     0   :  { %8 = vsyncpa [#allocation3], 0  ;;  %s331_s0 = inlined_call_operand.hbm [shape: f32[8,32], index: 0, kind: input, shape index: {}]   ;;  %s332_s1 = inlined_call_operand.hbm [shape: f32[32,128], index: 1, kind: input, shape index: {}]   ;;  %s333_s2 = inlined_call_operand.vmem [shape: f32[2,128], index: 2, kind: input, shape index: {}]   ;;  %s334_s3 = inlined_call_operand.hbm [shape: f32[8,128], index: 3, kind: output, shape index: {}]  }
   0x1   :  { %9 = vsyncpa [#allocation6], 0 }
   0x2   :  { %10 = vsyncpa [#allocation4], 0  ;;  %s254_s12 = smov [#allocation2]   ;;  %s255_s14 = smov [#allocation5]  }
   0x3   :  { %s17_s13 = sshll.u32 %s254_s12, 4  ;;  %s26_s15 = sshll.u32 %s255_s14, 4  ;;  %s18_s13 = int_to_ptr.vmem [resolvable:$true] %s17_s13  ;;  %s282_s15 = int_to_ptr.vmem [resolvable:$true] %s26_s15 }
   0x4   :  { %s182_s18 = scalar_lea.hbm %s331_s0, 128 }
   0x5   :  { %p183_p0 = scmp.ne.s32.totalorder %s331_s0, %s182_s18  ;;  %p186_p1 = scmp.lt.u32.totalorder %s182_s18, %s331_s0 }
   0x7   :  { %p188_p2 = pnand %p186_p1, %p183_p0 }
   0x9   :  { %191 = shalt.err (!%p188_p2)
}
   0xa   :  { %s192_s23 = scalar_lea.vmem %s18_s13, 128  ;;  %p197_p4 = scmp.lt.s32.totalorder %s18_s13, %s18_s13 }
   0xb   :  { %p193_p3 = scmp.ne.s32.totalorder %s18_s13, %s192_s23  ;;  %p198_p5 = scmp.lt.s32.totalorder %s192_s23, %s192_s23 }
   0xd   :  { %p199_p6 = por %p198_p5, %p197_p4 }
   0xf   :  { %p200_p7 = pnand %p199_p6, %p193_p3 }
  0x11   :  { %203 = shalt.err (!%p200_p7)
}
  0x12   :  { %20 = dma.hbm_to_vmem [thread:$0]  %s331_s0, 128, %s18_s13, [#allocation3]  }
  0x13   :  { %s204_s28 = scalar_lea.hbm %s332_s1, 512 }
  0x14   :  { %p205_p8 = scmp.ne.s32.totalorder %s332_s1, %s204_s28  ;;  %p208_p9 = scmp.lt.u32.totalorder %s204_s28, %s332_s1 }
  0x16   :  { %p210_p10 = pnand %p208_p9, %p205_p8 }
  0x18   :  { %213 = shalt.err (!%p210_p10)
}
  0x19   :  { %s214_s6 = scalar_lea.vmem %s282_s15, 512  ;;  %p219_p12 = scmp.lt.s32.totalorder %s282_s15, %s282_s15 }
  0x1a   :  { %p215_p11 = scmp.ne.s32.totalorder %s282_s15, %s214_s6  ;;  %p220_p13 = scmp.lt.s32.totalorder %s214_s6, %s214_s6 }
  0x1c   :  { %p221_p0 = por %p220_p13, %p219_p12 }
  0x1e   :  { %p222_p1 = pnand %p221_p0, %p215_p11 }
  0x20   :  { %225 = shalt.err (!%p222_p1)
}
  0x21   :  { %s256_s0 = smov 128   ;;  %s257_s7 = smov 8  }
  0x22   :  { %32 = dma.hbm_to_vmem [thread:$0]  %s332_s1, 512, %s282_s15, [#allocation6], %s256_s0, %s256_s0, %s257_s7  }
  0x23   :  { %248 = dma.done.wait [#allocation3], 128  }
  0x24   :  { %249 = vsyncadd [#allocation3], 4294967168 }
  0x25   :  { %250 = dma.done.wait [#allocation6], 512  }
  0x26   :  { %251 = vsyncadd [#allocation6], 4294966784  ;;  %v258_v0 = vmov 0.0|0.0   ;;  %vm259_vm0 = vmmov 0   ;;  %v260_v1 = vmov 0.0   ;;  %v42_v2 = vld [vmem:[#allocation5] sm:$0xff] }
  0x27   :  { %168 = vmatprep.subr.bf16.mxu0 %v258_v0  ;;  %165 = vmatprep.mubr.msk.f32.mxu0 %vm259_vm0, %v260_v1  ;;  %v43_v3 = vld [vmem:[#allocation5 + $0x8] sm:$0xff]  ;;  %v44_v4 = vld [vmem:[#allocation5 + $0x10] sm:$0xff]  ;;  %v45_v6 = vld [vmem:[#allocation5 + $0x18] sm:$0xff]  ;;  %vm46_vm1 = vcmask 261120   ;;  %s261_s13 = smov [#allocation7]  }
  0x28   :  { %v169_v5 = vpack.c.bf16 %v43_v3, %v42_v2  ;;  %v172_v7 = vpack.c.bf16 %v45_v6, %v44_v4  ;;  %v41_v8 = vld [vmem:[#allocation2] sm:$0xff]  ;;  %s139_s14 = sshll.u32 %s261_s13, 4  ;;  %s140_s14 = int_to_ptr.vmem [resolvable:$true] %s139_s14 }
  0x29   :  { %v150_v9 = vld [vmem:[%s333_s2] ss:$0 sm:$0xff]  ;;  %v151_v11 = vld [vmem:[%s333_s2 + $0x1] ss:$0 sm:$0xff]  ;;  %s226_s15 = scalar_lea.vmem %s140_s14, 128  ;;  %p231_p3 = scmp.lt.s32.totalorder %s140_s14, %s140_s14 }
  0x2a   :  { %170 = vmatpush3.bf16.msra.mxu0 %v169_v5  ;;  %p227_p2 = scmp.ne.s32.totalorder %s140_s14, %s226_s15  ;;  %p232_p4 = scmp.lt.s32.totalorder %s226_s15, %s226_s15 }
  0x2b   :  { %171 = vmatprep.subr.bf16.mxu0 %v258_v0 }
  0x2c   :  { %p233_p5 = por %p232_p4, %p231_p3 }
  0x2e   :  { %173 = vmatpush3.bf16.msra.mxu0 %v172_v7  ;;  %p234_p6 = pnand %p233_p5, %p227_p2 }
  0x31   :  { %166 = vmatmul.mubr.msk.f32.vlgmr.msra.gmra.mrb[0].mxu0 %vm46_vm1, %v41_v8 }
 0x104   :  { %v116_v10 = vpop.f32.mrb[0].mxu0 }
 0x105   :  { %v125_v12 = vmul.f32 %v150_v9, %v116_v10  ;;  %v167_v13 = vpop.f32.mrb[1].mxu0 }
 0x107   :  { %v131_v14 = vadd.f32 %v151_v11, %v125_v12 }
 0x109   :  { %132 = vst [vmem:[#allocation7] sm:$0xff] %v131_v14 }
 0x10a   :  { %237 = shalt.err (!%p234_p6)
}
 0x10b   :  { %s238_s18 = scalar_lea.hbm %s334_s3, 128 }
 0x10c   :  { %p239_p7 = scmp.ne.s32.totalorder %s334_s3, %s238_s18  ;;  %p242_p8 = scmp.lt.u32.totalorder %s238_s18, %s334_s3 }
 0x10e   :  { %p244_p9 = pnand %p242_p8, %p239_p7 }
 0x110   :  { %247 = shalt.err (!%p244_p9)
}
 0x111   :  { %142 = dma.vmem_to_hbm [thread:$0]  %s140_s14, 128, %s334_s3, [#allocation4]  }
 0x112   :  { %252 = dma.done.wait [#allocation4], 128  }
 0x113   :  { %253 = vsyncadd [#allocation4], 4294967168 }
 0x114   :  { %146 = vsyncpa [#allocation3], 1 }
 0x115   :  { %147 = vsyncpa [#allocation6], 1 }
 0x116   :  { %148 = vsyncpa [#allocation4], 1 }

</bundles_post_ra>
